<compile_context>
chip_gen: v7x
topology: tpu7x:2x2x1
jax: 0.10.0
libtpu: 0.0.40
codegen_flags: <defaults>
</compile_context>

<pallas_src>
import jax
import jax.numpy as jnp
from jax.experimental import pallas as pl
from jax.experimental.pallas import tpu as pltpu

# ----------------------------- configuration ------------------------------
B = 2          # batch
T = 516        # input samples  -> T1 = (516 - 8)//4 + 1 = 128
K = 8          # conv kernel size
S = 4          # conv stride (K == 2*S exploited for gather-free im2col)
H = 32         # hidden channels
COUT = 2       # binaural output channels
T1 = (T - K) // S + 1          # 128
N = B * T1                     # 256 (lane axis inside the kernel)
T_OUT = (T1 - 1) * S + K       # 516 == S * (T1 + 1)
R = COUT * S                   # 8 decoder output rows per tap group

# packed-slab row offsets (all multiples of 8 -> free f32 sublane slices)
W_ENC, W_G1, W_G2, W_DEC = 0, H, 3 * H, 5 * H        # 0, 32, 96, 160
W_ROWS = 5 * H + 2 * R                               # 176
B_ENC, B_G1, B_G2, B_DEC = 0, H, 3 * H, 5 * H        # 0, 32, 96, 160
B_ROWS = 5 * H + R                                   # 168


# ------------------------------ Pallas kernel ------------------------------
def demucs_kernel(xT_ref, w_ref, b_ref, o_main_ref, o_tail_ref):
    """Channel-major Demucs-style net; activations are [channels, B*T1]."""
    xT = xT_ref[...]                                              # [K, N]

    def sigmoid(g):
        # exp + approx reciprocal both run on the EUP slot (idle otherwise).
        return pl.reciprocal(1.0 + jnp.exp(-g), approx=True)

    # encoder Conv1d(1->H, K=8, S=4) as one matmul + ReLU
    h = jnp.dot(w_ref[W_ENC:W_ENC + H, 0:K], xT,
                preferred_element_type=jnp.float32) + b_ref[B_ENC:B_ENC + H, :]
    h = jnp.maximum(h, 0.0)                                       # [H, N]

    # 1x1 conv -> GLU  (value rows 0:H, gate rows H:2H of one stacked matmul)
    g1 = jnp.dot(w_ref[W_G1:W_G1 + 2 * H, :], h,
                 preferred_element_type=jnp.float32) + b_ref[B_G1:B_G1 + 2 * H, :]
    h = g1[0:H, :] * sigmoid(g1[H:2 * H, :])                      # [H, N]

    # decoder 1x1 conv -> GLU
    g2 = jnp.dot(w_ref[W_G2:W_G2 + 2 * H, :], h,
                 preferred_element_type=jnp.float32) + b_ref[B_G2:B_G2 + 2 * H, :]
    h = g2[0:H, :] * sigmoid(g2[H:2 * H, :])                      # [H, N]

    # ConvTranspose1d(H->COUT, K=8, S=4): low taps (k<S) rows 0:R and high
    # taps (k>=S) rows R:2R of one stacked matmul.
    yd = jnp.dot(w_ref[W_DEC:W_DEC + 2 * R, :], h,
                 preferred_element_type=jnp.float32)              # [2R, N]
    y_low = yd[0:R, :]
    y_high = yd[R:2 * R, :]
    bias = b_ref[B_DEC:B_DEC + R, :]                              # [R, 1]

    # fused overlap-add:
    #   out[b, c, S*u + r] = y_low[c*S+r, b*T1+u]
    #                      + y_high[c*S+r, b*T1+u-1]   (u >= 1)
    # Shift y_high one lane to the right on the XLU; lanes 0 and T1 pick up
    # wrapped / cross-batch values and are masked out of the main output.
    rolled = pltpu.roll(y_high, shift=1, axis=1)   # rolled[:, j] = y_high[:, j-1 mod N]

    # trailing overlap column (u = T1) per batch happens to sit exactly at
    # those two lanes: rolled[:, T1] = y_high[:, T1-1] (b=0),
    #                  rolled[:, 0]  = y_high[:, N-1]  (b=1)
    o_tail_ref[...] = jnp.concatenate(
        [rolled[:, T1:T1 + 1], rolled[:, 0:1]], axis=1) + bias    # [R, B]

    lane = jax.lax.broadcasted_iota(jnp.int32, (R, N), 1)
    rolled = jnp.where(lane % T1 == 0, 0.0, rolled)
    o_main_ref[...] = y_low + rolled + bias                       # [R, N] lane-dense


def run_net_audio_kernel(xT, wslab, bslab):
    cost = pl.CostEstimate(
        flops=2 * N * (K * H + 2 * H * H + 2 * H * H + 2 * R * H),
        transcendentals=4 * H * N,
        bytes_accessed=4 * (K * N + W_ROWS * H + B_ROWS + R * N + R * B),
    )
    return pl.pallas_call(
        demucs_kernel,
        out_shape=(jax.ShapeDtypeStruct((R, N), jnp.float32),
                   jax.ShapeDtypeStruct((R, B), jnp.float32)),
        in_specs=[pl.BlockSpec(memory_space=pltpu.MemorySpace.VMEM)] * 3,
        out_specs=(pl.BlockSpec(memory_space=pltpu.MemorySpace.VMEM),
                   pl.BlockSpec(memory_space=pltpu.MemorySpace.VMEM)),
        cost_estimate=cost,
    )(xT, wslab, bslab)


# ------------------------------- JAX glue ----------------------------------
def prepare_kernel_params(params, b_dec_out):
    """Pack torch-like weights into 2 channel-major VMEM slabs.

    Run ONCE outside the jitted per-call path (fixed weights => pure
    recurring overhead otherwise).
    """
    (w_enc, b_enc, w_g1, b_g1, w_g2, b_g2, w_dec) = params
    we_pad = jnp.zeros((H, H), jnp.float32).at[:, :K].set(w_enc.T)   # [H, H]
    w1 = jnp.concatenate([w_g1[:, :H].T, w_g1[:, H:].T], axis=0)     # [2H, H]
    w2 = jnp.concatenate([w_g2[:, :H].T, w_g2[:, H:].T], axis=0)     # [2H, H]
    wd3 = w_dec.reshape(H, COUT, K)                                  # [h, c, k]
    wdl = jnp.transpose(wd3[:, :, :S], (1, 2, 0)).reshape(R, H)      # low taps
    wdh = jnp.transpose(wd3[:, :, S:], (1, 2, 0)).reshape(R, H)      # high taps
    wslab = jnp.concatenate([we_pad, w1, w2, wdl, wdh], axis=0)      # [176, 32]

    be = b_enc.T                                                     # [H, 1]
    b1 = jnp.concatenate([b_g1[:, :H].T, b_g1[:, H:].T], axis=0)     # [2H, 1]
    b2 = jnp.concatenate([b_g2[:, :H].T, b_g2[:, H:].T], axis=0)     # [2H, 1]
    bd = jnp.repeat(b_dec_out, S).reshape(R, 1)                      # [R, 1]
    bslab = jnp.concatenate([be, b1, b2, bd], axis=0)                # [168, 1]
    return wslab, bslab


def net_audio_forward(audio_in, wslab, bslab):
    # audio_in: [B, 1, T]  (PyTorch NCW, C=1)
    x = audio_in[:, 0, :]                                            # [B, T]
    # gather-free transposed im2col (K == 2*S): taps 0..S-1 and S..K-1 are
    # two contiguous windows -> reshape/concat/transpose only.
    low = x[:, :S * T1].reshape(B, T1, S)                            # x[b, S*u + r]
    high = x[:, S:S * (T1 + 1)].reshape(B, T1, S)                    # x[b, S*u + S + r]
    xc = jnp.concatenate([low, high], axis=2)                        # [B, T1, K]
    xT = jnp.transpose(xc, (2, 0, 1)).reshape(K, N)                  # xT[k, b*T1 + u]

    z_main, z_tail = run_net_audio_kernel(xT, wslab, bslab)

    # reassemble: out[b, c, S*u + r], u in 0..T1 (u = T1 from z_tail)
    zm = z_main.reshape(COUT, S, B, T1)
    zt = z_tail.reshape(COUT, S, B, 1)
    full = jnp.concatenate([zm, zt], axis=3)                         # [c, r, b, u]
    out = jnp.transpose(full, (2, 0, 3, 1)).reshape(B, COUT, T_OUT)
    # Demucs-style view as [B, COUT, 1, T_OUT] (sources dim), squeezed later.
    return out.reshape(B, COUT, 1, T_OUT)


def center_trim(tensor, reference):
    ref_len = reference.shape[-1]
    delta = tensor.shape[-1] - ref_len
    if delta < 0:
        raise ValueError("tensor shorter than reference")
    if delta:
        tensor = tensor[..., delta // 2: tensor.shape[-1] - (delta - delta // 2)]
    return tensor


def demucs_model_forward(inputs, wslab, bslab):
    audio_mix = inputs["audio_mix"]                    # [B, T]
    audio_diff = inputs["audio_diff"]
    audio_gt = inputs["audio_gt"]

    input_audio = audio_mix[:, None, :]                # unsqueeze(1) -> [B,1,T]
    binaural_output = net_audio_forward(input_audio, wslab, bslab)
    binaural_output = jnp.squeeze(binaural_output, axis=2)   # [B, COUT, T_OUT]
    _ = center_trim(audio_diff, binaural_output)       # computed, unused (matches torch code)
    return {"binaural_output": binaural_output, "audio_gt": audio_gt}


# --------------------------- pure-JAX reference ----------------------------
def net_audio_reference(audio_in, params, b_dec_out):
    """Time-major reference (same math, different layout) for validation."""
    (w_enc, b_enc, w_g1, b_g1, w_g2, b_g2, w_dec) = params
    x = audio_in[:, 0, :]
    idx = jnp.arange(T1)[:, None] * S + jnp.arange(K)[None, :]
    xc = x[:, idx]                                     # [B, T1, K]
    h = jnp.maximum(xc @ w_enc + b_enc, 0.0)
    g = h @ w_g1 + b_g1
    h = g[..., :H] * jax.nn.sigmoid(g[..., H:])
    g = h @ w_g2 + b_g2
    h = g[..., :H] * jax.nn.sigmoid(g[..., H:])
    y = (h @ w_dec).reshape(B, T1, COUT, K)
    first = jnp.transpose(y[..., :S], (0, 2, 1, 3)).reshape(B, COUT, S * T1)
    second = jnp.transpose(y[..., S:], (0, 2, 1, 3)).reshape(B, COUT, S * T1)
    out = (jnp.pad(first, ((0, 0), (0, 0), (0, S)))
           + jnp.pad(second, ((0, 0), (0, 0), (S, 0))))
    return out + b_dec_out[None, :, None]


# ------------------------------- parameters --------------------------------
def init_params(key):
    ks = jax.random.split(key, 8)
    scale = 0.1
    w_enc = scale * jax.random.normal(ks[0], (K, H), jnp.float32)
    b_enc = scale * jax.random.normal(ks[1], (1, H), jnp.float32)
    w_g1 = scale * jax.random.normal(ks[2], (H, 2 * H), jnp.float32)
    b_g1 = scale * jax.random.normal(ks[3], (1, 2 * H), jnp.float32)
    w_g2 = scale * jax.random.normal(ks[4], (H, 2 * H), jnp.float32)
    b_g2 = scale * jax.random.normal(ks[5], (1, 2 * H), jnp.float32)
    w_dec = scale * jax.random.normal(ks[6], (H, COUT * K), jnp.float32)
    b_dec_out = scale * jax.random.normal(ks[7], (COUT,), jnp.float32)
    return (w_enc, b_enc, w_g1, b_g1, w_g2, b_g2, w_dec), b_dec_out


# --------------------------------- main -------------------------------------
if __name__ == "__main__":
    key = jax.random.PRNGKey(0)
    k_in, k_par = jax.random.split(key)
    ks = jax.random.split(k_in, 5)

    inputs = {
        "audio_left":  jax.random.normal(ks[0], (B, T), jnp.float32),
        "audio_right": jax.random.normal(ks[1], (B, T), jnp.float32),
        "audio_mix":   jax.random.normal(ks[2], (B, T), jnp.float32),
        "audio_diff":  jax.random.normal(ks[3], (B, T), jnp.float32),
        "audio_gt":    jax.random.normal(ks[4], (B, COUT, T_OUT), jnp.float32),
    }

    params, b_dec_out = init_params(k_par)

    # weight re-layout hoisted out of the per-call jitted path (done once).
    wslab, bslab = prepare_kernel_params(params, b_dec_out)
    jax.block_until_ready((wslab, bslab))

    fwd = jax.jit(demucs_model_forward)
    out = fwd(inputs, wslab, bslab)
    jax.block_until_ready(out["binaural_output"])

    # numerical check against the pure-JAX (time-major) reference
    ref = net_audio_reference(inputs["audio_mix"][:, None, :], params, b_dec_out)
    assert out["binaural_output"].shape == (B, COUT, T_OUT)
    assert out["audio_gt"].shape == (B, COUT, T_OUT)
    # tolerance allows for the EUP approx-reciprocal sigmoid
    assert jnp.allclose(out["binaural_output"], ref, atol=2e-3, rtol=2e-3), \
        "kernel output mismatch vs reference"
    print("KERNEL_OK")
</pallas_src>

<mosaic_0001>
module attributes {stable_mosaic.version = 11 : i64} {
  func.func @demucs_kernel(%arg0: memref<8x256xf32, #tpu.memory_space<vmem>>, %arg1: memref<176x32xf32, #tpu.memory_space<vmem>>, %arg2: memref<168x1xf32, #tpu.memory_space<vmem>>, %arg3: memref<8x256xf32, #tpu.memory_space<vmem>>, %arg4: memref<8x2xf32, #tpu.memory_space<vmem>>) attributes {dimension_semantics = [], scalar_prefetch = 0 : i64, scratch_operands = 0 : i64, tpu.core_type = #tpu.core_type<tc>} {
    %c0 = arith.constant 0 : index
    %c0_0 = arith.constant 0 : index
    %0 = vector.load %arg0[%c0, %c0_0] : memref<8x256xf32, #tpu.memory_space<vmem>>, vector<8x256xf32>
    %c0_1 = arith.constant 0 : index
    %c0_2 = arith.constant 0 : index
    %1 = vector.load %arg1[%c0_1, %c0_2] : memref<176x32xf32, #tpu.memory_space<vmem>>, vector<32x8xf32>
    %cst = arith.constant dense<0.000000e+00> : vector<32x256xf32>
    %2 = tpu.matmul %1, %0, %cst {dimension_numbers = #tpu.dot_dimension_numbers<[1], [0], [0], [1], [0, 0, 1, 1], [], []>} : vector<32x8xf32>, vector<8x256xf32>, vector<32x256xf32> -> vector<32x256xf32>
    %c0_3 = arith.constant 0 : index
    %c0_4 = arith.constant 0 : index
    %3 = vector.load %arg2[%c0_3, %c0_4] : memref<168x1xf32, #tpu.memory_space<vmem>>, vector<32x1xf32>
    %4 = vector.broadcast %3 : vector<32x1xf32> to vector<32x256xf32>
    %5 = arith.addf %2, %4 : vector<32x256xf32>
    %cst_5 = arith.constant 0.000000e+00 : f32
    %6 = vector.broadcast %cst_5 : f32 to vector<32x256xf32>
    %7 = arith.maximumf %5, %6 : vector<32x256xf32>
    %c32 = arith.constant 32 : index
    %c0_6 = arith.constant 0 : index
    %8 = vector.load %arg1[%c32, %c0_6] : memref<176x32xf32, #tpu.memory_space<vmem>>, vector<64x32xf32>
    %cst_7 = arith.constant dense<0.000000e+00> : vector<64x256xf32>
    %9 = tpu.matmul %8, %7, %cst_7 {dimension_numbers = #tpu.dot_dimension_numbers<[1], [0], [0], [1], [0, 0, 1, 1], [], []>} : vector<64x32xf32>, vector<32x256xf32>, vector<64x256xf32> -> vector<64x256xf32>
    %c32_8 = arith.constant 32 : index
    %c0_9 = arith.constant 0 : index
    %10 = vector.load %arg2[%c32_8, %c0_9] : memref<168x1xf32, #tpu.memory_space<vmem>>, vector<64x1xf32>
    %11 = vector.broadcast %10 : vector<64x1xf32> to vector<64x256xf32>
    %12 = arith.addf %9, %11 : vector<64x256xf32>
    %13 = vector.extract_strided_slice %12 {offsets = [0, 0], sizes = [32, 256], strides = [1, 1]} : vector<64x256xf32> to vector<32x256xf32>
    %14 = vector.extract_strided_slice %12 {offsets = [32, 0], sizes = [32, 256], strides = [1, 1]} : vector<64x256xf32> to vector<32x256xf32>
    %cst_10 = arith.constant 0.000000e+00 : f32
    %15 = vector.broadcast %cst_10 : f32 to vector<32x256xf32>
    %16 = arith.subf %15, %14 : vector<32x256xf32>
    %17 = math.exp %16 : vector<32x256xf32>
    %cst_11 = arith.constant 1.000000e+00 : f32
    %18 = vector.broadcast %cst_11 : f32 to vector<32x256xf32>
    %19 = arith.addf %18, %17 : vector<32x256xf32>
    %20 = tpu.reciprocal %19 {approx = true} : vector<32x256xf32> -> vector<32x256xf32>
    %21 = arith.mulf %13, %20 : vector<32x256xf32>
    %c96 = arith.constant 96 : index
    %c0_12 = arith.constant 0 : index
    %22 = vector.load %arg1[%c96, %c0_12] : memref<176x32xf32, #tpu.memory_space<vmem>>, vector<64x32xf32>
    %cst_13 = arith.constant dense<0.000000e+00> : vector<64x256xf32>
    %23 = tpu.matmul %22, %21, %cst_13 {dimension_numbers = #tpu.dot_dimension_numbers<[1], [0], [0], [1], [0, 0, 1, 1], [], []>} : vector<64x32xf32>, vector<32x256xf32>, vector<64x256xf32> -> vector<64x256xf32>
    %c96_14 = arith.constant 96 : index
    %c0_15 = arith.constant 0 : index
    %24 = vector.load %arg2[%c96_14, %c0_15] : memref<168x1xf32, #tpu.memory_space<vmem>>, vector<64x1xf32>
    %25 = vector.broadcast %24 : vector<64x1xf32> to vector<64x256xf32>
    %26 = arith.addf %23, %25 : vector<64x256xf32>
    %27 = vector.extract_strided_slice %26 {offsets = [0, 0], sizes = [32, 256], strides = [1, 1]} : vector<64x256xf32> to vector<32x256xf32>
    %28 = vector.extract_strided_slice %26 {offsets = [32, 0], sizes = [32, 256], strides = [1, 1]} : vector<64x256xf32> to vector<32x256xf32>
    %cst_16 = arith.constant 0.000000e+00 : f32
    %29 = vector.broadcast %cst_16 : f32 to vector<32x256xf32>
    %30 = arith.subf %29, %28 : vector<32x256xf32>
    %31 = math.exp %30 : vector<32x256xf32>
    %cst_17 = arith.constant 1.000000e+00 : f32
    %32 = vector.broadcast %cst_17 : f32 to vector<32x256xf32>
    %33 = arith.addf %32, %31 : vector<32x256xf32>
    %34 = tpu.reciprocal %33 {approx = true} : vector<32x256xf32> -> vector<32x256xf32>
    %35 = arith.mulf %27, %34 : vector<32x256xf32>
    %c160 = arith.constant 160 : index
    %c0_18 = arith.constant 0 : index
    %36 = vector.load %arg1[%c160, %c0_18] : memref<176x32xf32, #tpu.memory_space<vmem>>, vector<16x32xf32>
    %cst_19 = arith.constant dense<0.000000e+00> : vector<16x256xf32>
    %37 = tpu.matmul %36, %35, %cst_19 {dimension_numbers = #tpu.dot_dimension_numbers<[1], [0], [0], [1], [0, 0, 1, 1], [], []>} : vector<16x32xf32>, vector<32x256xf32>, vector<16x256xf32> -> vector<16x256xf32>
    %38 = vector.extract_strided_slice %37 {offsets = [0, 0], sizes = [8, 256], strides = [1, 1]} : vector<16x256xf32> to vector<8x256xf32>
    %39 = vector.extract_strided_slice %37 {offsets = [8, 0], sizes = [8, 256], strides = [1, 1]} : vector<16x256xf32> to vector<8x256xf32>
    %c160_20 = arith.constant 160 : index
    %c0_21 = arith.constant 0 : index
    %40 = vector.load %arg2[%c160_20, %c0_21] : memref<168x1xf32, #tpu.memory_space<vmem>>, vector<8x1xf32>
    %c1_i32 = arith.constant 1 : i32
    %41 = tpu.dynamic_rotate %39 by %c1_i32 dim 1 : vector<8x256xf32>, i32 -> vector<8x256xf32>
    %42 = vector.extract_strided_slice %41 {offsets = [0, 128], sizes = [8, 1], strides = [1, 1]} : vector<8x256xf32> to vector<8x1xf32>
    %43 = vector.extract_strided_slice %41 {offsets = [0, 0], sizes = [8, 1], strides = [1, 1]} : vector<8x256xf32> to vector<8x1xf32>
    %44 = tpu.concatenate %42, %43 in 1 : vector<8x1xf32>, vector<8x1xf32> -> vector<8x2xf32>
    %45 = vector.broadcast %40 : vector<8x1xf32> to vector<8x2xf32>
    %46 = arith.addf %44, %45 : vector<8x2xf32>
    %c0_22 = arith.constant 0 : index
    %c0_23 = arith.constant 0 : index
    %47 = vector.load %arg4[%c0_22, %c0_23] : memref<8x2xf32, #tpu.memory_space<vmem>>, vector<8x2xf32>
    tpu.vector_store %arg4[%c0_22, %c0_23], %46 {strides = array<i32>} : memref<8x2xf32, #tpu.memory_space<vmem>>, vector<8x2xf32>,
    %48 = tpu.iota {dimensions = array<i32: 1>} : vector<8x256xi32>
    %c128_i32 = arith.constant 128 : i32
    %c0_i32 = arith.constant 0 : i32
    %49 = arith.cmpi eq, %c128_i32, %c0_i32 : i32
    %c1_i32_24 = arith.constant 1 : i32
    %50 = arith.select %49, %c1_i32_24, %c128_i32 : i32
    %51 = vector.broadcast %50 : i32 to vector<8x256xi32>
    %52 = arith.remsi %48, %51 : vector<8x256xi32>
    %c0_i32_25 = arith.constant 0 : i32
    %53 = vector.broadcast %c0_i32_25 : i32 to vector<8x256xi32>
    %54 = arith.cmpi ne, %52, %53 : vector<8x256xi32>
    %c0_i32_26 = arith.constant 0 : i32
    %55 = vector.broadcast %c0_i32_26 : i32 to vector<8x256xi32>
    %56 = arith.cmpi slt, %52, %55 : vector<8x256xi32>
    %c0_i32_27 = arith.constant 0 : i32
    %57 = arith.cmpi slt, %50, %c0_i32_27 : i32
    %58 = vector.broadcast %57 : i1 to vector<8x256xi1>
    %59 = vector.broadcast %58 : vector<8x256xi1> to vector<8x256xi1>
    %60 = arith.xori %56, %59 : vector<8x256xi1>
    %61 = arith.andi %60, %54 : vector<8x256xi1>
    %62 = vector.broadcast %50 : i32 to vector<8x256xi32>
    %63 = arith.addi %52, %62 : vector<8x256xi32>
    %64 = arith.select %61, %63, %52 : vector<8x256xi1>, vector<8x256xi32>
    %c0_i32_28 = arith.constant 0 : i32
    %65 = vector.broadcast %c0_i32_28 : i32 to vector<8x256xi32>
    %66 = arith.cmpi eq, %64, %65 : vector<8x256xi32>
    %cst_29 = arith.constant 0.000000e+00 : f32
    %67 = vector.broadcast %cst_29 : f32 to vector<8x256xf32>
    %68 = arith.select %66, %67, %41 : vector<8x256xi1>, vector<8x256xf32>
    %69 = arith.addf %38, %68 : vector<8x256xf32>
    %70 = vector.broadcast %40 : vector<8x1xf32> to vector<8x256xf32>
    %71 = arith.addf %69, %70 : vector<8x256xf32>
    %c0_30 = arith.constant 0 : index
    %c0_31 = arith.constant 0 : index
    %72 = vector.load %arg3[%c0_30, %c0_31] : memref<8x256xf32, #tpu.memory_space<vmem>>, vector<8x256xf32>
    tpu.vector_store %arg3[%c0_30, %c0_31], %71 {strides = array<i32>} : memref<8x256xf32, #tpu.memory_space<vmem>>, vector<8x256xf32>,
    return
  }
}

</mosaic_0001>

<bundles_post_ra>
// kernel: demucs_model_forward.1
= control target key start
LH: loop header
LB: loop body
LE: loop exit
PB: predicated region body
PF: predicated region fallthrough
CT: control target
= control target key end

     0   :  { %v906_v2 = vmov 0.0   ;;  %vm46_vm0 = vcmask 64512   ;;  %v907_v4 = vmov 0   ;;  %vm212_vm1 = vcmask 261120   ;;  %s908_s22 = smov 1   ;;  %s1170_s0 = inlined_call_operand.vmem [shape: f32[8,256], index: 0, kind: input, shape index: {}]   ;;  %s1171_s1 = inlined_call_operand.vmem [shape: f32[176,32], index: 1, kind: input, shape index: {}]   ;;  %s1172_s2 = inlined_call_operand.vmem [shape: f32[168,1], index: 2, kind: input, shape index: {}]   ;;  %s1173_s3 = inlined_call_operand.vmem [shape: f32[8,256], index: 3, kind: output, shape index: {0}]   ;;  %s1174_s4 = inlined_call_operand.vmem [shape: f32[8,2], index: 4, kind: output, shape index: {1}]  }
   0x1   :  { %v17_v0 = vld [vmem:[%s1170_s0 + $0x8] sm:$0xff]  ;;  %v16_v1 = vld [vmem:[%s1170_s0] sm:$0xff]  ;;  %123 = vmatprep.mubr.f32.mxu0 %v906_v2  ;;  %840 = vset.pattern.permute.xlu0 %v907_v4  ;;  %v24_v6 = vld [vmem:[%s1172_s2 + $0x10] sm:$0xff]  ;;  %vm738_vm5 = vcmask 7168   ;;  %vm746_vm6 = vcmask 15360  }
   0x2   :  { %v18_v3 = vld [vmem:[%s1171_s1] sm:$0xff]  ;;  %59 = vmatprep.subr.mxu0 %v17_v0  ;;  %841 = vset.pattern.permute.xlu1 %v907_v4  ;;  %v19_v7 = vld [vmem:[%s1171_s1 + $0x8] sm:$0xff]  ;;  %v25_v9 = vld [vmem:[%s1172_s2 + $0x18] sm:$0xff] }
   0x3   :  { %60 = vmatpush1.msra.mxu0 %v16_v1  ;;  %v22_v5 = vld [vmem:[%s1172_s2] sm:$0xff]  ;;  %301 = vmatprep.mubr.f32.mxu1 %v906_v2  ;;  %v23_v8 = vld [vmem:[%s1172_s2 + $0x8] sm:$0xff]  ;;  %v20_v10 = vld [vmem:[%s1171_s1 + $0x10] sm:$0xff] }
   0x4   :  { %791 = vmatmul.mubr.msk.f32.vlgmr.msra.gmra.mrb[0].mxu0 %vm46_vm0, %v18_v3  ;;  %28 = vperm.xlu0 %840, %v22_v5   ;;  %v168_v11 = vld [vmem:[%s1172_s2 + $0x40] sm:$0xff]  ;;  %v169_v12 = vld [vmem:[%s1172_s2 + $0x48] sm:$0xff]  ;;  %v21_v13 = vld [vmem:[%s1171_s1 + $0x18] sm:$0xff] }
   0x5   :  { %129 = vmatprep.mubr.f32.mxu0 %v906_v2  ;;  %38 = vperm.xlu1 %841, %v24_v6   ;;  %v170_v14 = vld [vmem:[%s1172_s2 + $0x50] sm:$0xff]  ;;  %v171_v15 = vld [vmem:[%s1172_s2 + $0x58] sm:$0xff]  ;;  %v164_v16 = vld [vmem:[%s1172_s2 + $0x20] sm:$0xff] }
   0x6   :  { %v165_v17 = vld [vmem:[%s1172_s2 + $0x28] sm:$0xff]  ;;  %v166_v18 = vld [vmem:[%s1172_s2 + $0x30] sm:$0xff]  ;;  %v167_v19 = vld [vmem:[%s1172_s2 + $0x38] sm:$0xff] }
   0x7   :  { %v410_v20 = vld [vmem:[%s1172_s2 + $0x80] sm:$0xff]  ;;  %v411_v21 = vld [vmem:[%s1172_s2 + $0x88] sm:$0xff]  ;;  %v412_v22 = vld [vmem:[%s1172_s2 + $0x90] sm:$0xff] }
   0x8   :  { %792 = vmatmul.mubr.msk.f32.gmra.mrb[2].mxu0 %vm46_vm0, %v19_v7  ;;  %33 = vperm.xlu0 %840, %v23_v8   ;;  %v413_v23 = vld [vmem:[%s1172_s2 + $0x98] sm:$0xff]  ;;  %v406_v24 = vld [vmem:[%s1172_s2 + $0x60] sm:$0xff]  ;;  %v407_v25 = vld [vmem:[%s1172_s2 + $0x68] sm:$0xff] }
   0x9   :  { %135 = vmatprep.mubr.f32.mxu0 %v906_v2  ;;  %43 = vperm.xlu1 %841, %v25_v9   ;;  %v408_v26 = vld [vmem:[%s1172_s2 + $0x70] sm:$0xff]  ;;  %v409_v27 = vld [vmem:[%s1172_s2 + $0x78] sm:$0xff]  ;;  %v156_v60 = vld [vmem:[%s1171_s1 + $0x20] sm:$0xff] }
   0xa   :  { %v157_v61 = vld [vmem:[%s1171_s1 + $0x28] sm:$0xff]  ;;  %v158_v62 = vld [vmem:[%s1171_s1 + $0x30] sm:$0xff]  ;;  %v159_v63 = vld [vmem:[%s1171_s1 + $0x38] sm:$0xff] }
   0xb   :  { %v160_v0 = vld [vmem:[%s1171_s1 + $0x40] sm:$0xff]  ;;  %v161_v1 = vld [vmem:[%s1171_s1 + $0x48] sm:$0xff]  ;;  %v162_v3 = vld [vmem:[%s1171_s1 + $0x50] sm:$0xff] }
   0xc   :  { %793 = vmatmul.mubr.msk.f32.gmra.mrb[4].mxu0 %vm46_vm0, %v20_v10  ;;  %194 = vperm.xlu0 %840, %v168_v11   ;;  %v163_v4 = vld [vmem:[%s1171_s1 + $0x58] sm:$0xff] }
   0xd   :  { %141 = vmatprep.mubr.f32.mxu0 %v906_v2  ;;  %199 = vperm.xlu1 %841, %v169_v12  }
  0x10   :  { %794 = vmatmul.mubr.msk.f32.gmra.mrb[6].mxu0 %vm46_vm0, %v21_v13  ;;  %204 = vperm.xlu0 %840, %v170_v14  }
  0x11   :  { %209 = vperm.xlu1 %841, %v171_v15   ;;  %542 = vmatprep.mubr.f32.mxu0 %v906_v2 }
  0x14   :  { %174 = vperm.xlu0 %840, %v164_v16  }
  0x15   :  { %179 = vperm.xlu1 %841, %v165_v17  }
  0x18   :  { %184 = vperm.xlu0 %840, %v166_v18  }
  0x19   :  { %189 = vperm.xlu1 %841, %v167_v19  }
  0x1c   :  { %436 = vperm.xlu0 %840, %v410_v20  }
  0x1d   :  { %441 = vperm.xlu1 %841, %v411_v21  }
  0x20   :  { %446 = vperm.xlu0 %840, %v412_v22  }
  0x21   :  { %451 = vperm.xlu1 %841, %v413_v23  }
  0x24   :  { %416 = vperm.xlu0 %840, %v406_v24  }
  0x25   :  { %421 = vperm.xlu1 %841, %v407_v25  }
  0x28   :  { %426 = vperm.xlu0 %840, %v408_v26  }
  0x29   :  { %431 = vperm.xlu1 %841, %v409_v27  }
  0x83   :  { %v29_v28 = vpop.permute.xlu0 %28 }
  0x84   :  { %v39_v37 = vpop.permute.xlu1 %38 }
  0x87   :  { %v34_v32 = vpop.permute.xlu0 %33 }
  0x88   :  { %v44_v48 = vpop.permute.xlu1 %43 }
  0x8b   :  { %v195_v13 = vpop.permute.xlu0 %194 }
  0x8c   :  { %v200_v19 = vpop.permute.xlu1 %199 }
  0xd7   :  { %v125_v29 = vpop.f32.mrb[0].mxu0 }
  0xd8   :  { %v127_v30 = vpop.f32.mrb[1].mxu0  ;;  %v126_v31 = vadd.f32 %v125_v29, %v29_v28 }
  0xd9   :  { %v128_v33 = vadd.f32 %v127_v30, %v29_v28  ;;  %v205_v28 = vpop.permute.xlu0 %204 }
  0xda   :  { %v148_v39 = vmax.f32 %v126_v31, 0.0 }
  0xdb   :  { %v131_v34 = vpop.f32.mrb[2].mxu0  ;;  %v149_v41 = vmax.f32 %v128_v33, 0.0 }
  0xdc   :  { %v132_v35 = vadd.f32 %v131_v34, %v34_v32  ;;  %v133_v36 = vpop.f32.mrb[3].mxu0 }
  0xdd   :  { %v134_v38 = vadd.f32 %v133_v36, %v34_v32 }
  0xde   :  { %v150_v40 = vmax.f32 %v132_v35, 0.0 }
  0xdf   :  { %v151_v42 = vmax.f32 %v134_v38, 0.0  ;;  %v137_v43 = vpop.f32.mrb[4].mxu0 }
  0xe0   :  { %v139_v44 = vpop.f32.mrb[5].mxu0  ;;  %v815_v45 = vpack.c.bf16 %v150_v40, %v148_v39  ;;  %v138_v47 = vadd.f32 %v137_v43, %v39_v37 }
  0xe1   :  { %v813_v46 = vpack.c.bf16 %v151_v42, %v149_v41  ;;  %v140_v49 = vadd.f32 %v139_v44, %v39_v37  ;;  %v210_v37 = vpop.permute.xlu1 %209 }
  0xe2   :  { %v152_v54 = vmax.f32 %v138_v47, 0.0 }
  0xe3   :  { %v143_v50 = vpop.f32.mrb[6].mxu0  ;;  %814 = vmatprep.subr.bf16.mxu1 %v813_v46  ;;  %v153_v56 = vmax.f32 %v140_v49, 0.0 }
  0xe4   :  { %v144_v51 = vadd.f32 %v143_v50, %v44_v48  ;;  %v145_v52 = vpop.f32.mrb[7].mxu0  ;;  %816 = vmatpush1.bf16.msra.mxu1 %v815_v45 }
  0xe5   :  { %v146_v53 = vadd.f32 %v145_v52, %v44_v48 }
  0xe6   :  { %v154_v55 = vmax.f32 %v144_v51, 0.0 }
  0xe7   :  { %v155_v57 = vmax.f32 %v146_v53, 0.0 }
  0xe8   :  { %v819_v58 = vpack.c.bf16 %v154_v55, %v152_v54 }
  0xe9   :  { %v817_v59 = vpack.c.bf16 %v155_v57, %v153_v56 }
  0xeb   :  { %818 = vmatprep.subr.bf16.mxu1 %v817_v59 }
  0xec   :  { %820 = vmatpush1.bf16.msra.mxu1 %v819_v58 }
  0xef   :  { %795 = vmatmul.mubr.msk.f32.vlgmr.msra.gmra.mrb[0].mxu1 %vm212_vm1, %v156_v60 }
  0xf0   :  { %307 = vmatprep.mubr.f32.mxu1 %v906_v2 }
  0xf3   :  { %796 = vmatmul.mubr.msk.f32.gmra.mrb[2].mxu1 %vm212_vm1, %v157_v61  ;;  %v175_v61 = vpop.permute.xlu0 %174 }
  0xf4   :  { %313 = vmatprep.mubr.f32.mxu1 %v906_v2 }
  0xf7   :  { %797 = vmatmul.mubr.msk.f32.gmra.mrb[4].mxu1 %vm212_vm1, %v158_v62 }
  0xf8   :  { %319 = vmatprep.mubr.f32.mxu1 %v906_v2 }
  0xfb   :  { %798 = vmatmul.mubr.msk.f32.gmra.mrb[6].mxu1 %vm212_vm1, %v159_v63 }
  0xfc   :  { %325 = vmatprep.mubr.f32.mxu1 %v906_v2 }
  0xff   :  { %799 = vmatmul.mubr.msk.f32.gmra.mrb[8].mxu1 %vm212_vm1, %v160_v0 }
 0x100   :  { %331 = vmatprep.mubr.f32.mxu1 %v906_v2 }
 0x103   :  { %800 = vmatmul.mubr.msk.f32.gmra.mrb[10].mxu1 %vm212_vm1, %v161_v1 }
 0x104   :  { %337 = vmatprep.mubr.f32.mxu1 %v906_v2 }
 0x107   :  { %801 = vmatmul.mubr.msk.f32.gmra.mrb[12].mxu1 %vm212_vm1, %v162_v3 }
 0x108   :  { %343 = vmatprep.mubr.f32.mxu1 %v906_v2 }
 0x10b   :  { %802 = vmatmul.mubr.msk.f32.gmra.mrb[14].mxu1 %vm212_vm1, %v163_v4 }
 0x10c   :  { %711 = vmatprep.mubr.f32.mxu1 %v906_v2 }
 0x1c2   :  { %v1062_v5 = vpop.f32.mrb[0].mxu1 }
 0x1c3   :  { %v1064_v6 = vpop.f32.mrb[1].mxu1  ;;  %v304_v63 = vadd.f32 %v1062_v5, %v175_v61 }
 0x1c4   :  { %v306_v1 = vadd.f32 %v1064_v6, %v175_v61 }
 0x1c6   :  { %v1066_v7 = vpop.f32.mrb[2].mxu1 }
 0x1c7   :  { %v1068_v8 = vpop.f32.mrb[3].mxu1 }
 0x1ca   :  { %v1070_v9 = vpop.f32.mrb[4].mxu1 }
 0x1cb   :  { %v1072_v10 = vpop.f32.mrb[5].mxu1 }
 0x1ce   :  { %v1074_v11 = vpop.f32.mrb[6].mxu1 }
 0x1cf   :  { %v1076_v12 = vpop.f32.mrb[7].mxu1 }
 0x1d2   :  { %v327_v14 = vpop.f32.mrb[8].mxu1 }
 0x1d3   :  { %v328_v15 = vadd.f32 %v327_v14, %v195_v13  ;;  %v329_v16 = vpop.f32.mrb[9].mxu1 }
 0x1d4   :  { %v330_v17 = vadd.f32 %v329_v16, %v195_v13 }
 0x1d5   :  { %v350_v18 = vsub.f32 0.0, %v328_v15  ;;  %v180_v15 = vpop.permute.xlu1 %179 }
 0x1d6   :  { %v351_v20 = vsub.f32 0.0, %v330_v17  ;;  %v333_v21 = vpop.f32.mrb[10].mxu1  ;;  %v310_v17 = vadd.f32 %v1066_v7, %v180_v15 }
 0x1d7   :  { %v358_v22 = vmul.f32 1.442695, %v350_v18  ;;  %v334_v23 = vadd.f32 %v333_v21, %v200_v19  ;;  %v335_v24 = vpop.f32.mrb[11].mxu1 }
 0x1d8   :  { %v360_v25 = vmul.f32 1.442695, %v351_v20  ;;  %v336_v26 = vadd.f32 %v335_v24, %v200_v19  ;;  %v312_v20 = vadd.f32 %v1068_v8, %v180_v15 }
 0x1d9   :  { %842 = vpow2.f32 %v358_v22  ;;  %v352_v27 = vsub.f32 0.0, %v334_v23  ;;  %v185_v22 = vpop.permute.xlu0 %184 }
 0x1da   :  { %844 = vpow2.f32 %v360_v25  ;;  %v353_v29 = vsub.f32 0.0, %v336_v26  ;;  %v339_v30 = vpop.f32.mrb[12].mxu1  ;;  %v316_v6 = vadd.f32 %v1070_v9, %v185_v22  ;;  %v318_v26 = vadd.f32 %v1072_v10, %v185_v22  ;;  %v398_v10 = vld [vmem:[%s1171_s1 + $0x60] sm:$0xff] }
 0x1db   :  { %v362_v31 = vmul.f32 1.442695, %v352_v27  ;;  %v340_v32 = vadd.f32 %v339_v30, %v205_v28  ;;  %v341_v33 = vpop.f32.mrb[13].mxu1  ;;  %v190_v30 = vpop.permute.xlu1 %189 }
 0x1dc   :  { %v364_v34 = vmul.f32 1.442695, %v353_v29  ;;  %v342_v35 = vadd.f32 %v341_v33, %v205_v28  ;;  %v324_v33 = vadd.f32 %v1076_v12, %v190_v30  ;;  %v400_v12 = vld [vmem:[%s1171_s1 + $0x70] sm:$0xff] }
 0x1dd   :  { %846 = vpow2.f32 %v362_v31  ;;  %v354_v36 = vsub.f32 0.0, %v340_v32  ;;  %v322_v31 = vadd.f32 %v1074_v11, %v190_v30  ;;  %v399_v11 = vld [vmem:[%s1171_s1 + $0x68] sm:$0xff] }
 0x1de   :  { %848 = vpow2.f32 %v364_v34  ;;  %v355_v38 = vsub.f32 0.0, %v342_v35  ;;  %v345_v39 = vpop.f32.mrb[14].mxu1 }
 0x1df   :  { %v366_v40 = vmul.f32 1.442695, %v354_v36  ;;  %v346_v41 = vadd.f32 %v345_v39, %v210_v37  ;;  %v347_v42 = vpop.f32.mrb[15].mxu1  ;;  %v403_v39 = vld [vmem:[%s1171_s1 + $0x88] sm:$0xff] }
 0x1e0   :  { %v368_v43 = vmul.f32 1.442695, %v355_v38  ;;  %v348_v44 = vadd.f32 %v347_v42, %v210_v37  ;;  %v401_v37 = vld [vmem:[%s1171_s1 + $0x78] sm:$0xff]  ;;  %v402_v38 = vld [vmem:[%s1171_s1 + $0x80] sm:$0xff] }
 0x1e1   :  { %850 = vpow2.f32 %v366_v40  ;;  %v356_v45 = vsub.f32 0.0, %v346_v41  ;;  %v404_v40 = vld [vmem:[%s1171_s1 + $0x90] sm:$0xff]  ;;  %v405_v41 = vld [vmem:[%s1171_s1 + $0x98] sm:$0xff] }
 0x1e2   :  { %852 = vpow2.f32 %v368_v43  ;;  %v357_v46 = vsub.f32 0.0, %v348_v44 }
 0x1e3   :  { %v843_v47 = vpop.eup %842  ;;  %v370_v48 = vmul.f32 1.442695, %v356_v45 }
 0x1e4   :  { %v845_v49 = vpop.eup %844  ;;  %v374_v50 = vadd.f32 1.0, %v843_v47  ;;  %v372_v51 = vmul.f32 1.442695, %v357_v46 }
 0x1e5   :  { %v375_v52 = vadd.f32 1.0, %v845_v49  ;;  %854 = vpow2.f32 %v370_v48 }
 0x1e6   :  { %856 = vrcp.f32 %v374_v50  ;;  %v437_v50 = vpop.permute.xlu0 %436 }
 0x1e7   :  { %v847_v53 = vpop.eup %846  ;;  %858 = vrcp.f32 %v375_v52 }
 0x1e8   :  { %v849_v54 = vpop.eup %848  ;;  %v376_v55 = vadd.f32 1.0, %v847_v53  ;;  %860 = vpow2.f32 %v372_v51 }
 0x1e9   :  { %v377_v56 = vadd.f32 1.0, %v849_v54 }
 0x1ea   :  { %862 = vrcp.f32 %v376_v55 }
 0x1eb   :  { %v851_v57 = vpop.eup %850  ;;  %864 = vrcp.f32 %v377_v56  ;;  %v442_v56 = vpop.permute.xlu1 %441 }
 0x1ec   :  { %v853_v58 = vpop.eup %852  ;;  %v378_v59 = vadd.f32 1.0, %v851_v57 }
 0x1ed   :  { %v379_v60 = vadd.f32 1.0, %v853_v58 }
 0x1ee   :  { %866 = vrcp.f32 %v378_v59 }
 0x1ef   :  { %v855_v62 = vpop.eup %854  ;;  %868 = vrcp.f32 %v379_v60 }
 0x1f0   :  { %v857_v0 = vpop.eup %856  ;;  %v380_v3 = vadd.f32 1.0, %v855_v62 }
 0x1f1   :  { %v859_v4 = vpop.eup %858  ;;  %v390_v13 = vmul.f32 %v857_v0, %v304_v63 }
 0x1f2   :  { %v861_v14 = vpop.eup %860  ;;  %870 = vrcp.f32 %v380_v3  ;;  %v391_v16 = vmul.f32 %v859_v4, %v306_v1  ;;  %v447_v1 = vpop.permute.xlu0 %446 }
 0x1f3   :  { %v381_v18 = vadd.f32 1.0, %v861_v14 }
 0x1f4   :  { %v863_v19 = vpop.eup %862 }
 0x1f5   :  { %v865_v21 = vpop.eup %864  ;;  %872 = vrcp.f32 %v381_v18  ;;  %v392_v5 = vmul.f32 %v863_v19, %v310_v17  ;;  %v452_v19 = vpop.permute.xlu1 %451 }
 0x1f6   :  { %v393_v23 = vmul.f32 %v865_v21, %v312_v20 }
 0x1f7   :  { %v823_v24 = vpack.c.bf16 %v392_v5, %v390_v13 }
 0x1f8   :  { %v867_v25 = vpop.eup %866  ;;  %v821_v27 = vpack.c.bf16 %v393_v23, %v391_v16 }
 0x1f9   :  { %v869_v28 = vpop.eup %868  ;;  %v394_v29 = vmul.f32 %v867_v25, %v316_v6 }
 0x1fa   :  { %822 = vmatprep.subr.bf16.mxu0 %v821_v27  ;;  %v395_v7 = vmul.f32 %v869_v28, %v318_v26 }
 0x1fb   :  { %824 = vmatpush1.bf16.msra.mxu0 %v823_v24 }
 0x1fc   :  { %v871_v8 = vpop.eup %870 }
 0x1fd   :  { %v396_v32 = vmul.f32 %v871_v8, %v322_v31 }
 0x1ff   :  { %v873_v34 = vpop.eup %872  ;;  %v827_v35 = vpack.c.bf16 %v396_v32, %v394_v29 }
 0x200   :  { %v397_v9 = vmul.f32 %v873_v34, %v324_v33 }
 0x202   :  { %v825_v36 = vpack.c.bf16 %v397_v9, %v395_v7 }
 0x204   :  { %826 = vmatprep.subr.bf16.mxu0 %v825_v36 }
 0x205   :  { %828 = vmatpush1.bf16.msra.mxu0 %v827_v35 }
 0x208   :  { %803 = vmatmul.mubr.msk.f32.vlgmr.msra.gmra.mrb[8].mxu0 %vm212_vm1, %v398_v10 }
 0x209   :  { %548 = vmatprep.mubr.f32.mxu0 %v906_v2 }
 0x20c   :  { %804 = vmatmul.mubr.msk.f32.gmra.mrb[10].mxu0 %vm212_vm1, %v399_v11  ;;  %v417_v11 = vpop.permute.xlu0 %416 }
 0x20d   :  { %554 = vmatprep.mubr.f32.mxu0 %v906_v2 }
 0x210   :  { %805 = vmatmul.mubr.msk.f32.gmra.mrb[12].mxu0 %vm212_vm1, %v400_v12 }
 0x211   :  { %560 = vmatprep.mubr.f32.mxu0 %v906_v2 }
 0x214   :  { %806 = vmatmul.mubr.msk.f32.gmra.mrb[14].mxu0 %vm212_vm1, %v401_v37 }
 0x215   :  { %566 = vmatprep.mubr.f32.mxu0 %v906_v2 }
 0x218   :  { %807 = vmatmul.mubr.msk.f32.gmra.mrb[16].mxu0 %vm212_vm1, %v402_v38 }
 0x219   :  { %572 = vmatprep.mubr.f32.mxu0 %v906_v2 }
 0x21c   :  { %808 = vmatmul.mubr.msk.f32.gmra.mrb[18].mxu0 %vm212_vm1, %v403_v39 }
 0x21d   :  { %578 = vmatprep.mubr.f32.mxu0 %v906_v2 }
 0x220   :  { %809 = vmatmul.mubr.msk.f32.gmra.mrb[20].mxu0 %vm212_vm1, %v404_v40 }
 0x221   :  { %584 = vmatprep.mubr.f32.mxu0 %v906_v2 }
 0x224   :  { %810 = vmatmul.mubr.msk.f32.gmra.mrb[22].mxu0 %vm212_vm1, %v405_v41 }
 0x2db   :  { %v1125_v42 = vpop.f32.mrb[8].mxu0 }
 0x2dc   :  { %v1127_v43 = vpop.f32.mrb[9].mxu0  ;;  %v545_v37 = vadd.f32 %v1125_v42, %v417_v11 }
 0x2dd   :  { %v547_v39 = vadd.f32 %v1127_v43, %v417_v11 }
 0x2df   :  { %v1129_v44 = vpop.f32.mrb[10].mxu0 }
 0x2e0   :  { %v1131_v45 = vpop.f32.mrb[11].mxu0 }
 0x2e3   :  { %v1133_v46 = vpop.f32.mrb[12].mxu0 }
 0x2e4   :  { %v1135_v47 = vpop.f32.mrb[13].mxu0 }
 0x2e7   :  { %v1137_v48 = vpop.f32.mrb[14].mxu0 }
 0x2e8   :  { %v1139_v49 = vpop.f32.mrb[15].mxu0 }
 0x2eb   :  { %v568_v51 = vpop.f32.mrb[16].mxu0 }
 0x2ec   :  { %v569_v52 = vadd.f32 %v568_v51, %v437_v50  ;;  %v570_v53 = vpop.f32.mrb[17].mxu0 }
 0x2ed   :  { %v571_v54 = vadd.f32 %v570_v53, %v437_v50 }
 0x2ee   :  { %v591_v55 = vsub.f32 0.0, %v569_v52  ;;  %v422_v52 = vpop.permute.xlu1 %421 }
 0x2ef   :  { %v592_v57 = vsub.f32 0.0, %v571_v54  ;;  %v574_v58 = vpop.f32.mrb[18].mxu0  ;;  %v551_v54 = vadd.f32 %v1129_v44, %v422_v52 }
 0x2f0   :  { %v599_v59 = vmul.f32 1.442695, %v591_v55  ;;  %v575_v60 = vadd.f32 %v574_v58, %v442_v56  ;;  %v576_v61 = vpop.f32.mrb[19].mxu0 }
 0x2f1   :  { %v601_v62 = vmul.f32 1.442695, %v592_v57  ;;  %v577_v63 = vadd.f32 %v576_v61, %v442_v56  ;;  %v553_v57 = vadd.f32 %v1131_v45, %v422_v52 }
 0x2f2   :  { %874 = vpow2.f32 %v599_v59  ;;  %v593_v0 = vsub.f32 0.0, %v575_v60  ;;  %v427_v59 = vpop.permute.xlu0 %426 }
 0x2f3   :  { %876 = vpow2.f32 %v601_v62  ;;  %v594_v3 = vsub.f32 0.0, %v577_v63  ;;  %v580_v4 = vpop.f32.mrb[20].mxu0  ;;  %v557_v43 = vadd.f32 %v1133_v46, %v427_v59  ;;  %v559_v63 = vadd.f32 %v1135_v47, %v427_v59  ;;  %v639_v47 = vld [vmem:[%s1171_s1 + $0xa0] sm:$0xff] }
 0x2f4   :  { %v603_v13 = vmul.f32 1.442695, %v593_v0  ;;  %v581_v14 = vadd.f32 %v580_v4, %v447_v1  ;;  %v582_v15 = vpop.f32.mrb[21].mxu0  ;;  %v432_v4 = vpop.permute.xlu1 %431 }
 0x2f5   :  { %v605_v16 = vmul.f32 1.442695, %v594_v3  ;;  %v583_v17 = vadd.f32 %v582_v15, %v447_v1  ;;  %v565_v15 = vadd.f32 %v1139_v49, %v432_v4 }
 0x2f6   :  { %878 = vpow2.f32 %v603_v13  ;;  %v595_v18 = vsub.f32 0.0, %v581_v14  ;;  %v563_v13 = vadd.f32 %v1137_v48, %v432_v4  ;;  %v640_v48 = vld [vmem:[%s1171_s1 + $0xa8] sm:$0xff] }
 0x2f7   :  { %880 = vpow2.f32 %v605_v16  ;;  %v596_v20 = vsub.f32 0.0, %v583_v17  ;;  %v586_v21 = vpop.f32.mrb[22].mxu0 }
 0x2f8   :  { %v607_v5 = vmul.f32 1.442695, %v595_v18  ;;  %v587_v22 = vadd.f32 %v586_v21, %v452_v19  ;;  %v588_v23 = vpop.f32.mrb[23].mxu0 }
 0x2f9   :  { %v609_v6 = vmul.f32 1.442695, %v596_v20  ;;  %v589_v24 = vadd.f32 %v588_v23, %v452_v19 }
 0x2fa   :  { %882 = vpow2.f32 %v607_v5  ;;  %v597_v25 = vsub.f32 0.0, %v587_v22  ;;  %v724_v5 = vld [vmem:[%s1172_s2 + $0xa0] sm:$0xff]  ;;  %v729_v22 = vlaneseq }
 0x2fb   :  { %884 = vpow2.f32 %v609_v6  ;;  %v598_v26 = vsub.f32 0.0, %v589_v24 }
 0x2fc   :  { %v875_v27 = vpop.eup %874  ;;  %v611_v28 = vmul.f32 1.442695, %v597_v25 }
 0x2fd   :  { %v877_v29 = vpop.eup %876  ;;  %v615_v30 = vadd.f32 1.0, %v875_v27  ;;  %v613_v7 = vmul.f32 1.442695, %v598_v26 }
 0x2fe   :  { %v616_v31 = vadd.f32 1.0, %v877_v29  ;;  %886 = vpow2.f32 %v611_v28 }
 0x2ff   :  { %888 = vrcp.f32 %v615_v30 }
 0x300   :  { %v879_v8 = vpop.eup %878  ;;  %890 = vrcp.f32 %v616_v31 }
 0x301   :  { %v881_v32 = vpop.eup %880  ;;  %v617_v33 = vadd.f32 1.0, %v879_v8  ;;  %892 = vpow2.f32 %v613_v7 }
 0x302   :  { %v618_v34 = vadd.f32 1.0, %v881_v32 }
 0x303   :  { %894 = vrcp.f32 %v617_v33 }
 0x304   :  { %v883_v35 = vpop.eup %882  ;;  %896 = vrcp.f32 %v618_v34 }
 0x305   :  { %v885_v9 = vpop.eup %884  ;;  %v619_v36 = vadd.f32 1.0, %v883_v35 }
 0x306   :  { %v620_v10 = vadd.f32 1.0, %v885_v9 }
 0x307   :  { %898 = vrcp.f32 %v619_v36 }
 0x308   :  { %v887_v12 = vpop.eup %886  ;;  %900 = vrcp.f32 %v620_v10 }
 0x309   :  { %v889_v38 = vpop.eup %888  ;;  %v621_v40 = vadd.f32 1.0, %v887_v12 }
 0x30a   :  { %v891_v41 = vpop.eup %890  ;;  %v631_v50 = vmul.f32 %v889_v38, %v545_v37 }
 0x30b   :  { %v893_v51 = vpop.eup %892  ;;  %902 = vrcp.f32 %v621_v40  ;;  %v632_v53 = vmul.f32 %v891_v41, %v547_v39 }
 0x30c   :  { %v622_v55 = vadd.f32 1.0, %v893_v51 }
 0x30d   :  { %v895_v56 = vpop.eup %894 }
 0x30e   :  { %v897_v58 = vpop.eup %896  ;;  %904 = vrcp.f32 %v622_v55  ;;  %v633_v42 = vmul.f32 %v895_v56, %v551_v54 }
 0x30f   :  { %v634_v60 = vmul.f32 %v897_v58, %v553_v57 }
 0x310   :  { %v831_v61 = vpack.c.bf16 %v633_v42, %v631_v50 }
 0x311   :  { %v899_v62 = vpop.eup %898  ;;  %v829_v0 = vpack.c.bf16 %v634_v60, %v632_v53 }
 0x312   :  { %v901_v1 = vpop.eup %900  ;;  %v635_v3 = vmul.f32 %v899_v62, %v557_v43 }
 0x313   :  { %830 = vmatprep.subr.bf16.mxu1 %v829_v0  ;;  %v636_v44 = vmul.f32 %v901_v1, %v559_v63 }
 0x314   :  { %832 = vmatpush1.bf16.msra.mxu1 %v831_v61 }
 0x315   :  { %v903_v45 = vpop.eup %902 }
 0x316   :  { %v637_v14 = vmul.f32 %v903_v45, %v563_v13 }
 0x318   :  { %v905_v16 = vpop.eup %904  ;;  %v835_v17 = vpack.c.bf16 %v637_v14, %v635_v3 }
 0x319   :  { %v638_v46 = vmul.f32 %v905_v16, %v565_v15 }
 0x31b   :  { %v833_v18 = vpack.c.bf16 %v638_v46, %v636_v44 }
 0x31d   :  { %834 = vmatprep.subr.bf16.mxu1 %v833_v18 }
 0x31e   :  { %836 = vmatpush1.bf16.msra.mxu1 %v835_v17 }
 0x321   :  { %811 = vmatmul.mubr.msk.f32.vlgmr.msra.gmra.mrb[16].mxu1 %vm212_vm1, %v639_v47 }
 0x322   :  { %717 = vmatprep.mubr.f32.mxu1 %v906_v2  ;;  %v730_v2 = vand.u32 127, %v729_v22 }
 0x324   :  { %vm731_vm2 = vcmp.lt.s32.totalorder %v730_v2, 1  ;;  %v748_v24 = vadd.s32 128, %v730_v2  ;;  %vm773_vm4 = vcmp.eq.s32.totalorder %v730_v2, 0 }
 0x325   :  { %812 = vmatmul.mubr.msk.f32.gmra.mrb[18].mxu1 %vm212_vm1, %v640_v48 }
 0x326   :  { %v760_v26 = vand.u32 127, %v748_v24 }
 0x328   :  { %vm774_vm3 = vcmp.eq.s32.totalorder %v760_v26, 0 }
 0x3f4   :  { %v713_v49 = vpop.f32.mrb[16].mxu1 }
 0x3f5   :  { %v715_v19 = vpop.f32.mrb[17].mxu1 }
 0x3f8   :  { %v719_v20 = vpop.f32.mrb[18].mxu1 }
 0x3f9   :  { %725 = vrot.lane.b32.xlu0 %v719_v20, %s908_s22  ;;  %v721_v21 = vpop.f32.mrb[19].mxu1 }
 0x3fa   :  { %727 = vrot.lane.b32.xlu1 %v721_v21, %s908_s22 }
 0x3fd   :  { %742 = vperm.xlu0 %840, %v724_v5  }
 0x46b   :  { %v726_v23 = vpop.permute.xlu0 %725 }
 0x46c   :  { %v728_v6 = vpop.permute.xlu1 %727 }
 0x46d   :  { %v733_v25 = vsel %vm731_vm2, %v728_v6, %v726_v23  ;;  %v732_v27 = vsel %vm731_vm2, %v726_v23, %v728_v6 }
 0x46e   :  { %735 = vrot.lane.b32.xlu1 %v733_v25, %s908_s22  ;;  %v776_v28 = vsel %vm774_vm3, 0.0, %v732_v27  ;;  %v775_v29 = vsel %vm773_vm4, 0.0, %v733_v25 }
 0x46f   :  { %v777_v30 = vadd.f32 %v775_v29, %v713_v49  ;;  %v778_v7 = vadd.f32 %v776_v28, %v715_v19 }
 0x47c   :  { %v743_v31 = vpop.permute.xlu0 %742 }
 0x47d   :  { %v779_v8 = vadd.f32 %v777_v30, %v743_v31  ;;  %v780_v32 = vadd.f32 %v778_v7, %v743_v31 }
 0x47f   :  { %781 = vst [vmem:[%s1173_s3] sm:$0xff] %v779_v8  ;;  %782 = vst [vmem:[%s1173_s3 + $0x8] sm:$0xff] %v780_v32 }
 0x4e0   :  { %v736_v33 = vpop.permute.xlu1 %735 }
 0x4e1   :  { %v739_v34 = vsel %vm738_vm5, %v732_v27, %v736_v33 }
 0x4e2   :  { %v745_v35 = vadd.f32 %v743_v31, %v739_v34 }
 0x4e4   :  { %747 = vst.msk [vmem:[%s1174_s4] sm:$0xff] %vm746_vm6, %v745_v35 }

</bundles_post_ra>
